<compile_context>
chip_gen: v6e
topology: v6e:2x2x1
jax: 0.10.0
libtpu: 0.0.40
codegen_flags: <defaults>
</compile_context>

<pallas_src>
import functools

import jax
import jax.numpy as jnp
from jax import lax
from jax.experimental import pallas as pl
from jax.experimental.pallas import tpu as pltpu


def _soft_argmax_kernel(x_ref, coords_ref, o_ref, *, temperature):
    """One row-block of flattened heatmaps -> expected [x, y] per row.

    x_ref:      (bm, H*W)  heatmap rows (one row = one (b, c) map).
    coords_ref: (H*W, 3)   columns [x, y, 1]; resident across grid steps.
    o_ref:      (bm, 2)    output [x, y].
    """
    x = x_ref[...].astype(jnp.float32)
    if temperature != 1.0:
        x = x * jnp.float32(temperature)

    # Numerically stable exp; softmax normalization deferred to the epilogue.
    m = jnp.max(x, axis=-1, keepdims=True)            # (bm, 1)
    e = jnp.exp(x - m)                                # (bm, H*W)

    # Single fused pass over `e`: [sum(e*x), sum(e*y), sum(e)] on the MXU.
    # precision=HIGHEST keeps full f32 accuracy (no silent bf16 truncation).
    sums = jnp.dot(e, coords_ref[...],
                   preferred_element_type=jnp.float32,
                   precision=lax.Precision.HIGHEST)   # (bm, 3)

    inv = 1.0 / sums[:, 2:3]                          # exact per-row reciprocal
    o_ref[...] = (sums[:, 0:2] * inv).astype(o_ref.dtype)


def _round_up(n, k):
    return ((n + k - 1) // k) * k


def _tpu_params():
    """Per-generation VMEM sizing + multi-TensorCore flag."""
    vmem_cap = None
    try:
        vmem_cap = int(pltpu.get_tpu_info().vmem_capacity_bytes)
    except Exception:
        vmem_cap = None
    if not vmem_cap:
        vmem_cap = 64 * 1024 * 1024  # most conservative of v5e/v6e/v7x

    kind = ""
    try:
        kind = jax.devices()[0].device_kind.lower()
    except Exception:
        pass
    # dimension_semantics=("parallel",) only shards the grid across cores on
    # multi-TensorCore chips (v7x, and megacore v4/v5p).
    multi_tc = ("7" in kind) or ("v4" in kind) or ("v5p" in kind)

    vmem_limit = min(vmem_cap * 3 // 4, vmem_cap - 8 * 1024 * 1024)
    tile_budget = vmem_limit * 3 // 4
    return tile_budget, vmem_limit, multi_tc


def spatial_soft_argmax2d(x, temperature=1.0, normalized_coordinates=True,
                          eps=1e-08):
    """Pallas implementation of SpatialSoftArgmax2d.forward.

    x: (B, C, H, W) heatmap.  Returns (B, C, 2) expected [x, y] coordinates.
    `eps` is accepted for API parity but (as in the reference forward) unused.
    """
    B, C, H, W = x.shape
    BC, HW = B * C, H * W

    # (B, C, H, W) -> (BC, HW): free reshape; lane axis = H*W (lane-dense).
    xf = x.reshape(BC, HW)

    # Coordinate grid [x, y, 1] in the flattened layout, built once here (no
    # in-kernel int32 div/mod), kept resident in VMEM across grid steps.
    if normalized_coordinates:
        xs = jnp.linspace(-1.0, 1.0, W, dtype=jnp.float32)  # W==1 -> [-1.0]
        ys = jnp.linspace(-1.0, 1.0, H, dtype=jnp.float32)
    else:
        xs = jnp.arange(W, dtype=jnp.float32)
        ys = jnp.arange(H, dtype=jnp.float32)
    coords = jnp.stack([
        jnp.broadcast_to(xs[None, :], (H, W)).reshape(HW),
        jnp.broadcast_to(ys[:, None], (H, W)).reshape(HW),
        jnp.ones((HW,), jnp.float32),
    ], axis=-1)                                              # (HW, 3)

    tile_budget, vmem_limit, multi_tc = _tpu_params()

    # Live VMEM per step: 2x double-buffered input tile (x.dtype) + ~3 f32
    # temporaries of shape (bm, HW); coords (HW, 3) is negligible.
    itemsize = jnp.dtype(x.dtype).itemsize
    bytes_per_row = HW * (2 * itemsize + 3 * 4)
    max_bm = max(8, min(8192, tile_budget // max(1, bytes_per_row)) // 8 * 8)

    if BC < 8:
        bm = BC                       # block == full dim (allowed by (8,128) rule)
    else:
        bm = min(max_bm, (BC // 8) * 8)
        if multi_tc and BC >= 16:
            steps = pl.cdiv(BC, bm)
            if steps % 2 == 1:
                # Try to give both TensorCores equal work (even grid).
                cand = _round_up(pl.cdiv(BC, steps + 1), 8)
                if cand >= 8 and pl.cdiv(BC, cand) % 2 == 0:
                    bm = cand
    grid = (pl.cdiv(BC, bm),)
    # Ragged last block (if BC % bm != 0): OOB rows read garbage and their
    # writes are masked by Pallas.  Every row is independent, so this is safe
    # and avoids a full-array jnp.pad copy in HBM.

    kernel = functools.partial(_soft_argmax_kernel,
                               temperature=float(temperature))

    cost = pl.CostEstimate(
        flops=8 * BC * HW + 4 * BC,
        transcendentals=BC * HW,
        bytes_accessed=BC * HW * itemsize + HW * 3 * 4 + BC * 2 * itemsize,
    )

    out = pl.pallas_call(
        kernel,
        out_shape=jax.ShapeDtypeStruct((BC, 2), x.dtype),
        grid_spec=pltpu.PrefetchScalarGridSpec(
            num_scalar_prefetch=0,
            grid=grid,
            in_specs=[
                pl.BlockSpec((bm, HW), lambda i: (i, 0)),
                pl.BlockSpec((HW, 3), lambda i: (0, 0)),   # stays resident
            ],
            out_specs=pl.BlockSpec((bm, 2), lambda i: (i, 0)),
        ),
        compiler_params=pltpu.CompilerParams(
            dimension_semantics=("parallel",),
            vmem_limit_bytes=int(vmem_limit),
        ),
        cost_estimate=cost,
    )(xf, coords)

    return out.reshape(B, C, 2)


class SpatialSoftArgmax2d:
    """Mirror of the PyTorch module (no learned parameters)."""

    def __init__(self, temperature=1.0, normalized_coordinates=True, eps=1e-08):
        self.temperature = temperature
        self.normalized_coordinates = normalized_coordinates
        self.eps = eps

    def __call__(self, x):
        return spatial_soft_argmax2d(
            x, self.temperature, self.normalized_coordinates, self.eps
        )


def _reference(x, temperature=1.0, normalized_coordinates=True):
    """Pure-JAX reference for correctness check."""
    B, C, H, W = x.shape
    flat = x.reshape(B, C, H * W) * temperature
    p = jax.nn.softmax(flat, axis=-1)
    if normalized_coordinates:
        xs = jnp.linspace(-1.0, 1.0, W, dtype=jnp.float32)
        ys = jnp.linspace(-1.0, 1.0, H, dtype=jnp.float32)
    else:
        xs = jnp.arange(W, dtype=jnp.float32)
        ys = jnp.arange(H, dtype=jnp.float32)
    pos_x = jnp.tile(xs[None, :], (H, 1)).reshape(-1)
    pos_y = jnp.tile(ys[:, None], (1, W)).reshape(-1)
    ex = jnp.sum(pos_x * p, axis=-1)
    ey = jnp.sum(pos_y * p, axis=-1)
    return jnp.stack([ex, ey], axis=-1)


if __name__ == "__main__":
    key = jax.random.PRNGKey(0)
    x = jax.random.normal(key, (2, 4, 16, 16), dtype=jnp.float32)

    module = SpatialSoftArgmax2d(temperature=1.0, normalized_coordinates=True)
    out = module(x)
    out = jax.block_until_ready(out)

    ref = _reference(x, temperature=1.0, normalized_coordinates=True)
    assert out.shape == (2, 4, 2), out.shape
    assert jnp.allclose(out, ref, atol=1e-5, rtol=1e-5), "mismatch vs reference"

    print("KERNEL_OK")
</pallas_src>

<mosaic_0001>
module attributes {stable_mosaic.version = 11 : i64} {
  func.func @_soft_argmax_kernel(%arg0: i32, %arg1: memref<8x256xf32, #tpu.memory_space<vmem>>, %arg2: memref<256x3xf32, #tpu.memory_space<vmem>>, %arg3: memref<8x2xf32, #tpu.memory_space<vmem>>) attributes {dimension_semantics = [#tpu.dimension_semantics<parallel>], iteration_bounds = array<i64: 1>, scalar_prefetch = 0 : i64, scratch_operands = 0 : i64, tpu.core_type = #tpu.core_type<tc>, window_params = [{transform_indices = @transform_0, window_bounds = array<i64: 8, 256>}, {pipeline_mode = #tpu.pipeline_mode<synchronous>, transform_indices = @transform_1, window_bounds = array<i64: 256, 3>}, {transform_indices = @transform_2, window_bounds = array<i64: 8, 2>}]} {
    %c0 = arith.constant 0 : index
    %c0_0 = arith.constant 0 : index
    %0 = vector.load %arg1[%c0, %c0_0] : memref<8x256xf32, #tpu.memory_space<vmem>>, vector<8x256xf32>
    %cst = arith.constant dense<0xFF800000> : vector<8xf32>
    %1 = vector.multi_reduction <maximumf>, %0, %cst [1] : vector<8x256xf32> to vector<8xf32>
    %2 = vector.shape_cast %1 : vector<8xf32> to vector<8x1xf32>
    %3 = vector.broadcast %2 : vector<8x1xf32> to vector<8x256xf32>
    %4 = arith.subf %0, %3 : vector<8x256xf32>
    %5 = math.exp %4 : vector<8x256xf32>
    %c0_1 = arith.constant 0 : index
    %c0_2 = arith.constant 0 : index
    %6 = vector.load %arg2[%c0_1, %c0_2] : memref<256x3xf32, #tpu.memory_space<vmem>>, vector<256x3xf32>
    %cst_3 = arith.constant dense<0.000000e+00> : vector<8x3xf32>
    %7 = tpu.matmul %5, %6, %cst_3 {dimension_numbers = #tpu.dot_dimension_numbers<[1], [0], [0], [1], [0, 0, 1, 1], [], []>, precision = #tpu.contract_precision<fp32>} : vector<8x256xf32>, vector<256x3xf32>, vector<8x3xf32> -> vector<8x3xf32>
    %8 = vector.extract_strided_slice %7 {offsets = [0, 2], sizes = [8, 1], strides = [1, 1]} : vector<8x3xf32> to vector<8x1xf32>
    %cst_4 = arith.constant 1.000000e+00 : f32
    %9 = vector.broadcast %cst_4 : f32 to vector<8x1xf32>
    %10 = arith.divf %9, %8 : vector<8x1xf32>
    %11 = vector.extract_strided_slice %7 {offsets = [0, 0], sizes = [8, 2], strides = [1, 1]} : vector<8x3xf32> to vector<8x2xf32>
    %12 = vector.broadcast %10 : vector<8x1xf32> to vector<8x2xf32>
    %13 = arith.mulf %11, %12 : vector<8x2xf32>
    %c0_5 = arith.constant 0 : index
    %c0_6 = arith.constant 0 : index
    %14 = vector.load %arg3[%c0_5, %c0_6] : memref<8x2xf32, #tpu.memory_space<vmem>>, vector<8x2xf32>
    tpu.vector_store %arg3[%c0_5, %c0_6], %13 {strides = array<i32>} : memref<8x2xf32, #tpu.memory_space<vmem>>, vector<8x2xf32>,
    return
  }
  func.func @transform_0(%arg0: i32) -> (i32, i32) {
    %c0_i32 = arith.constant 0 : i32
    %c0_i32_0 = arith.constant 0 : i32
    return %arg0, %c0_i32 : i32, i32
  }
  func.func @transform_1(%arg0: i32) -> (i32, i32) {
    %c0_i32 = arith.constant 0 : i32
    %c0_i32_0 = arith.constant 0 : i32
    %c0_i32_1 = arith.constant 0 : i32
    return %c0_i32, %c0_i32_0 : i32, i32
  }
  func.func @transform_2(%arg0: i32) -> (i32, i32) {
    %c0_i32 = arith.constant 0 : i32
    %c0_i32_0 = arith.constant 0 : i32
    return %arg0, %c0_i32 : i32, i32
  }
}

</mosaic_0001>

<bundles_post_ra>
// kernel: tpu_custom_call.1
= control target key start
LH: loop header
LB: loop body
LE: loop exit
PB: predicated region body
PF: predicated region fallthrough
CT: control target
= control target key end

     0   :  { %vm924_vm0 = vcmask 15360   ;;  %s1778_s0 = inlined_call_operand.vmem [shape: f32[8,256], index: 0, kind: input, shape index: {}]   ;;  %s1779_s1 = inlined_call_operand.vmem [shape: f32[256,3], index: 1, kind: input, shape index: {}]   ;;  %s1780_s2 = inlined_call_operand.vmem [shape: f32[8,2], index: 2, kind: output, shape index: {}]  }
   0x1   :  { %v1167_v0 = vld [vmem:[%s1778_s0] sm:$0xff]  ;;  %v1172_v1 = vld [vmem:[%s1778_s0 + $0x8] sm:$0xff]  ;;  %v53_v2 = vld [vmem:[%s1779_s1 + $0xf8] sm:$0xff] }
   0x2   :  { %v13_v3 = vmax.f32 %v1167_v0, %v1172_v1  ;;  %v1179_v4 = vand.u32 4294901760, %v53_v2  ;;  %v37_v5 = vld [vmem:[%s1779_s1 + $0x78] sm:$0xff]  ;;  %v52_v6 = vld [vmem:[%s1779_s1 + $0xf0] sm:$0xff]  ;;  %v51_v11 = vld [vmem:[%s1779_s1 + $0xe8] sm:$0xff] }
   0x3   :  { %v36_v7 = vld [vmem:[%s1779_s1 + $0x70] sm:$0xff]  ;;  %v1190_v8 = vand.u32 4294901760, %v37_v5  ;;  %v1192_v9 = vand.u32 4294901760, %v52_v6  ;;  %v35_v12 = vld [vmem:[%s1779_s1 + $0x68] sm:$0xff]  ;;  %v50_v13 = vld [vmem:[%s1779_s1 + $0xe0] sm:$0xff]  ;;  %v1208_v15 = vand.u32 4294901760, %v51_v11 }
   0x4   :  { %v1194_v10 = vand.u32 4294901760, %v36_v7  ;;  %14 = vmax.xlane.f32.xlu0 %v13_v3  ;;  %v1206_v14 = vsub.f32 %v53_v2, %v1179_v4  ;;  %v1210_v16 = vand.u32 4294901760, %v35_v12  ;;  %v1212_v17 = vand.u32 4294901760, %v50_v13  ;;  %v34_v18 = vld [vmem:[%s1779_s1 + $0x60] sm:$0xff]  ;;  %930 = vmatprep.subr.mxu0 %v1179_v4  ;;  %v49_v39 = vld [vmem:[%s1779_s1 + $0xd8] sm:$0xff]  ;;  %v48_v45 = vld [vmem:[%s1779_s1 + $0xd0] sm:$0xff] }
   0x5   :  { %v1219_v19 = vsub.f32 %v37_v5, %v1190_v8  ;;  %v1222_v20 = vsub.f32 %v52_v6, %v1192_v9  ;;  %v1227_v22 = vand.u32 4294901760, %v34_v18  ;;  %931 = vmatpush3.msra.mxu0 %v1190_v8  ;;  %v1232_v24 = vsub.f32 %v51_v11, %v1208_v15  ;;  %v33_v44 = vld [vmem:[%s1779_s1 + $0x58] sm:$0xff]  ;;  %v32_v46 = vld [vmem:[%s1779_s1 + $0x50] sm:$0xff]  ;;  %v47_v51 = vld [vmem:[%s1779_s1 + $0xc8] sm:$0xff] }
   0x6   :  { %v1225_v21 = vsub.f32 %v36_v7, %v1194_v10  ;;  %v1800_v23 = vand.u32 4294901760, %v1206_v14  ;;  %v1235_v25 = vsub.f32 %v35_v12, %v1210_v16  ;;  %v1238_v26 = vsub.f32 %v50_v13, %v1212_v17  ;;  %932 = vmatprep.subr.mxu0 %v1192_v9  ;;  %v31_v52 = vld [vmem:[%s1779_s1 + $0x48] sm:$0xff]  ;;  %v46_v53 = vld [vmem:[%s1779_s1 + $0xc0] sm:$0xff] }
   0x7   :  { %v1796_v27 = vand.u32 4294901760, %v1219_v19  ;;  %v1795_v28 = vand.u32 4294901760, %v1222_v20  ;;  %v1245_v30 = vsub.f32 %v34_v18, %v1227_v22  ;;  %933 = vmatpush3.msra.mxu0 %v1194_v10  ;;  %v1792_v32 = vand.u32 4294901760, %v1232_v24  ;;  %v30_v58 = vld [vmem:[%s1779_s1 + $0x40] sm:$0xff] }
   0x8   :  { %v1793_v29 = vand.u32 4294901760, %v1225_v21  ;;  %v282_v31 = vsub.f32 %v1206_v14, %v1800_v23  ;;  %v1791_v33 = vand.u32 4294901760, %v1235_v25  ;;  %v1790_v34 = vand.u32 4294901760, %v1238_v26  ;;  %934 = vmatprep.subr.mxu0 %v1208_v15  ;;  %v25_v23 = vld [vmem:[%s1779_s1 + $0x18] sm:$0xff] }
   0x9   :  { %v170_v35 = vsub.f32 %v1219_v19, %v1796_v27  ;;  %v289_v36 = vsub.f32 %v1222_v20, %v1795_v28  ;;  %v1789_v38 = vand.u32 4294901760, %v1245_v30  ;;  %935 = vmatpush3.msra.mxu0 %v1210_v16  ;;  %v296_v41 = vsub.f32 %v1232_v24, %v1792_v32  ;;  %v41_v27 = vld [vmem:[%s1779_s1 + $0x98] sm:$0xff] }
   0xa   :  { %v177_v37 = vsub.f32 %v1225_v21, %v1793_v29  ;;  %v283_v40 = vand.u32 4294901760, %v282_v31  ;;  %v184_v42 = vsub.f32 %v1235_v25, %v1791_v33  ;;  %v303_v43 = vsub.f32 %v1238_v26, %v1790_v34  ;;  %936 = vmatprep.subr.mxu0 %v1212_v17 }
   0xb   :  { %v171_v47 = vand.u32 4294901760, %v170_v35  ;;  %v290_v48 = vand.u32 4294901760, %v289_v36  ;;  %v191_v50 = vsub.f32 %v1245_v30, %v1789_v38  ;;  %937 = vmatpush3.msra.mxu0 %v1227_v22  ;;  %v297_v54 = vand.u32 4294901760, %v296_v41 }
   0xc   :  { %v178_v49 = vand.u32 4294901760, %v177_v37  ;;  %965 = vmatprep.subr.mxu1 %v283_v40  ;;  %v185_v55 = vand.u32 4294901760, %v184_v42  ;;  %v304_v56 = vand.u32 4294901760, %v303_v43  ;;  %v1301_v57 = vand.u32 4294901760, %v49_v39 }
   0xd   :  { %966 = vmatpush3.msra.mxu1 %v171_v47  ;;  %v192_v59 = vand.u32 4294901760, %v191_v50  ;;  %v1306_v60 = vand.u32 4294901760, %v33_v44  ;;  %v1308_v61 = vand.u32 4294901760, %v48_v45  ;;  %v1310_v62 = vand.u32 4294901760, %v32_v46 }
   0xe   :  { %967 = vmatprep.subr.mxu1 %v290_v48  ;;  %v1313_v63 = vsub.f32 %v49_v39, %v1301_v57  ;;  %v1315_v2 = vand.u32 4294901760, %v47_v51  ;;  %v1317_v3 = vand.u32 4294901760, %v31_v52  ;;  %v1319_v5 = vand.u32 4294901760, %v46_v53  ;;  %938 = vmatprep.subr.mxu0 %v1301_v57 }
   0xf   :  { %968 = vmatpush3.msra.mxu1 %v178_v49  ;;  %v1323_v6 = vsub.f32 %v33_v44, %v1306_v60  ;;  %v1326_v7 = vsub.f32 %v48_v45, %v1308_v61  ;;  %v1329_v11 = vsub.f32 %v32_v46, %v1310_v62  ;;  %v1331_v12 = vand.u32 4294901760, %v30_v58  ;;  %939 = vmatpush3.msra.mxu0 %v1306_v60  ;;  %v45_v49 = vld [vmem:[%s1779_s1 + $0xb8] sm:$0xff] }
  0x10   :  { %969 = vmatprep.subr.mxu1 %v297_v54  ;;  %v1788_v13 = vand.u32 4294901760, %v1313_v63  ;;  %v1336_v18 = vsub.f32 %v47_v51, %v1315_v2  ;;  %v1339_v31 = vsub.f32 %v31_v52, %v1317_v3  ;;  %v1342_v35 = vsub.f32 %v46_v53, %v1319_v5  ;;  %940 = vmatprep.subr.mxu0 %v1308_v61  ;;  %v29_v54 = vld [vmem:[%s1779_s1 + $0x38] sm:$0xff] }
  0x11   :  { %970 = vmatpush3.msra.mxu1 %v185_v55  ;;  %v1787_v36 = vand.u32 4294901760, %v1323_v6  ;;  %v1785_v37 = vand.u32 4294901760, %v1326_v7  ;;  %v1784_v39 = vand.u32 4294901760, %v1329_v11  ;;  %v1349_v40 = vsub.f32 %v30_v58, %v1331_v12  ;;  %941 = vmatpush3.msra.mxu0 %v1310_v62  ;;  %v44_v55 = vld [vmem:[%s1779_s1 + $0xb0] sm:$0xff] }
  0x12   :  { %1843 = vst [vmem:[#allocation2_spill] sm:$0xff] %v1342_v35  ;;  %971 = vmatprep.subr.mxu1 %v304_v56  ;;  %v310_v41 = vsub.f32 %v1313_v63, %v1788_v13  ;;  %v1783_v42 = vand.u32 4294901760, %v1336_v18  ;;  %v1782_v43 = vand.u32 4294901760, %v1339_v31  ;;  %v1781_v44 = vand.u32 4294901760, %v1342_v35  ;;  %942 = vmatprep.subr.mxu0 %v1315_v2  ;;  %v28_v56 = vld [vmem:[%s1779_s1 + $0x30] sm:$0xff] }
  0x13   :  { %1844 = vst [vmem:[#allocation3_spill] sm:$0xff] %v1349_v40  ;;  %972 = vmatpush3.msra.mxu1 %v192_v59  ;;  %v198_v45 = vsub.f32 %v1323_v6, %v1787_v36  ;;  %v317_v46 = vsub.f32 %v1326_v7, %v1785_v37  ;;  %v205_v47 = vsub.f32 %v1329_v11, %v1784_v39  ;;  %v1786_v48 = vand.u32 4294901760, %v1349_v40  ;;  %v42_v39 = vld [vmem:[%s1779_s1 + $0xa0] sm:$0xff] }
  0x14   :  { %943 = vmatpush3.msra.mxu0 %v1317_v3  ;;  %v311_v50 = vand.u32 4294901760, %v310_v41  ;;  %v324_v51 = vsub.f32 %v1336_v18, %v1783_v42  ;;  %v212_v52 = vsub.f32 %v1339_v31, %v1782_v43  ;;  %v331_v53 = vsub.f32 %v1342_v35, %v1781_v44  ;;  %v43_v43 = vld [vmem:[%s1779_s1 + $0xa8] sm:$0xff] }
  0x15   :  { %944 = vmatprep.subr.mxu0 %v1319_v5  ;;  %v199_v58 = vand.u32 4294901760, %v198_v45  ;;  %v318_v59 = vand.u32 4294901760, %v317_v46  ;;  %v206_v41 = vand.u32 4294901760, %v205_v47  ;;  %v219_v44 = vsub.f32 %v1349_v40, %v1786_v48  ;;  %v27_v42 = vld [vmem:[%s1779_s1 + $0x28] sm:$0xff]  ;;  %v26_v48 = vld [vmem:[%s1779_s1 + $0x20] sm:$0xff] }
  0x16   :  { %945 = vmatpush3.msra.mxu0 %v1331_v12  ;;  %973 = vmatprep.subr.mxu1 %v311_v50  ;;  %v325_v45 = vand.u32 4294901760, %v324_v51  ;;  %v213_v46 = vand.u32 4294901760, %v212_v52  ;;  %v332_v47 = vand.u32 4294901760, %v331_v53  ;;  %v1405_v37 = vand.u32 4294901760, %v45_v49 }
  0x17   :  { %974 = vmatpush3.msra.mxu1 %v199_v58  ;;  %v220_v36 = vand.u32 4294901760, %v219_v44  ;;  %v1410_v13 = vand.u32 4294901760, %v29_v54  ;;  %v1412_v38 = vand.u32 4294901760, %v44_v55  ;;  %v1414_v34 = vand.u32 4294901760, %v28_v56 }
  0x18   :  { %975 = vmatprep.subr.mxu1 %v318_v59  ;;  %v1417_v50 = vsub.f32 %v45_v49, %v1405_v37  ;;  %v1419_v51 = vand.u32 4294901760, %v43_v43  ;;  %v1421_v52 = vand.u32 4294901760, %v27_v42  ;;  %v1423_v53 = vand.u32 4294901760, %v42_v39  ;;  %946 = vmatprep.subr.mxu0 %v1405_v37 }
  0x19   :  { %976 = vmatpush3.msra.mxu1 %v206_v41  ;;  %v1427_v44 = vsub.f32 %v29_v54, %v1410_v13  ;;  %v1430_v58 = vsub.f32 %v44_v55, %v1412_v38  ;;  %v1433_v59 = vsub.f32 %v28_v56, %v1414_v34  ;;  %v1435_v49 = vand.u32 4294901760, %v26_v48  ;;  %947 = vmatpush3.msra.mxu0 %v1410_v13 }
  0x1a   :  { %1845 = vst [vmem:[#allocation4_spill] sm:$0xff] %v1417_v50  ;;  %1846 = vst [vmem:[#allocation5_spill] sm:$0xff] %v1423_v53  ;;  %977 = vmatprep.subr.mxu1 %v325_v45  ;;  %v1794_v33 = vand.u32 4294901760, %v1417_v50  ;;  %v1440_v32 = vsub.f32 %v43_v43, %v1419_v51  ;;  %v1443_v41 = vsub.f32 %v27_v42, %v1421_v52  ;;  %948 = vmatprep.subr.mxu0 %v1412_v38 }
  0x1b   :  { %1847 = vst [vmem:[#allocation6_spill] sm:$0xff] %v1427_v44  ;;  %1848 = vst [vmem:[#allocation7_spill] sm:$0xff] %v1430_v58  ;;  %v1446_v54 = vsub.f32 %v42_v39, %v1423_v53  ;;  %978 = vmatpush3.msra.mxu1 %v213_v46  ;;  %v1797_v55 = vand.u32 4294901760, %v1427_v44  ;;  %v1798_v56 = vand.u32 4294901760, %v1430_v58  ;;  %v1799_v45 = vand.u32 4294901760, %v1433_v59  ;;  %949 = vmatpush3.msra.mxu0 %v1414_v34 }
  0x1c   :  { %1849 = vst [vmem:[#allocation8_spill] sm:$0xff] %v1433_v59  ;;  %1850 = vst [vmem:[#allocation9_spill] sm:$0xff] %v1435_v49  ;;  %v1453_v29 = vsub.f32 %v26_v48, %v1435_v49  ;;  %979 = vmatprep.subr.mxu1 %v332_v47  ;;  %v338_v39 = vsub.f32 %v1417_v50, %v1794_v33  ;;  %v1801_v42 = vand.u32 4294901760, %v1440_v32  ;;  %v1802_v43 = vand.u32 4294901760, %v1443_v41 }
  0x1d   :  { %1851 = vst [vmem:[#allocation10_spill] sm:$0xff] %v1440_v32  ;;  %1852 = vst [vmem:[#allocation11_spill] sm:$0xff] %v1443_v41  ;;  %v1807_v46 = vand.u32 4294901760, %v1446_v54  ;;  %950 = vmatprep.subr.mxu0 %v1419_v51  ;;  %980 = vmatpush3.msra.mxu1 %v220_v36  ;;  %v226_v48 = vsub.f32 %v1427_v44, %v1797_v55  ;;  %v345_v47 = vsub.f32 %v1430_v58, %v1798_v56  ;;  %v38_v58 = vld [vmem:[%s1779_s1 + $0x80] sm:$0xff] }
  0x1e   :  { %1853 = vst [vmem:[#allocation12_spill] sm:$0xff] %v1446_v54  ;;  %1854 = vst [vmem:[#allocation13_spill] sm:$0xff] %v1453_v29  ;;  %v233_v33 = vsub.f32 %v1433_v59, %v1799_v45  ;;  %951 = vmatpush3.msra.mxu0 %v1421_v52  ;;  %v339_v36 = vand.u32 4294901760, %v338_v39  ;;  %v352_v55 = vsub.f32 %v1440_v32, %v1801_v42  ;;  %v40_v39 = vld [vmem:[%s1779_s1 + $0x90] sm:$0xff]  ;;  %v1855_v32 = vand.u32 4294901760, %v1453_v29  ;;  %v23_v59 = vld [vmem:[%s1779_s1 + $0x8] sm:$0xff] }
  0x1f   :  { %v240_v56 = vsub.f32 %v1443_v41, %v1802_v43  ;;  %v359_v45 = vsub.f32 %v1446_v54, %v1807_v46  ;;  %v24_v42 = vld [vmem:[%s1779_s1 + $0x10] sm:$0xff]  ;;  %952 = vmatprep.subr.mxu0 %v1423_v53  ;;  %v227_v28 = vand.u32 4294901760, %v226_v48  ;;  %v346_v43 = vand.u32 4294901760, %v345_v47  ;;  %v39_v54 = vld [vmem:[%s1779_s1 + $0x88] sm:$0xff] }
  0x20   :  { %v234_v41 = vand.u32 4294901760, %v233_v33  ;;  %v247_v46 = vsub.f32 %v1453_v29, %v1855_v32  ;;  %953 = vmatpush3.msra.mxu0 %v1435_v49  ;;  %981 = vmatprep.subr.mxu1 %v339_v36  ;;  %v353_v33 = vand.u32 4294901760, %v352_v55  ;;  %v1509_v44 = vand.u32 4294901760, %v41_v27  ;;  %v22_v32 = vld [vmem:[%s1779_s1] sm:$0xff] }
  0x21   :  { %v241_v48 = vand.u32 4294901760, %v240_v56  ;;  %v360_v47 = vand.u32 4294901760, %v359_v45  ;;  %982 = vmatpush3.msra.mxu1 %v227_v28  ;;  %v1514_v50 = vand.u32 4294901760, %v25_v23  ;;  %v1516_v40 = vand.u32 4294901760, %v40_v39 }
  0x22   :  { %v248_v29 = vand.u32 4294901760, %v247_v46  ;;  %v1518_v53 = vand.u32 4294901760, %v24_v42  ;;  %983 = vmatprep.subr.mxu1 %v346_v43  ;;  %v1521_v36 = vsub.f32 %v41_v27, %v1509_v44  ;;  %v1523_v55 = vand.u32 4294901760, %v39_v54  ;;  %954 = vmatprep.subr.mxu0 %v1509_v44 }
  0x23   :  { %v1525_v56 = vand.u32 4294901760, %v23_v59  ;;  %v1527_v45 = vand.u32 4294901760, %v38_v58  ;;  %984 = vmatpush3.msra.mxu1 %v234_v41  ;;  %v1531_v28 = vsub.f32 %v25_v23, %v1514_v50  ;;  %v1534_v46 = vsub.f32 %v40_v39, %v1516_v40  ;;  %955 = vmatpush3.msra.mxu0 %v1514_v50 }
  0x24   :  { %1856 = vst [vmem:[#allocation14_spill] sm:$0xff] %v1518_v53  ;;  %1857 = vst [vmem:[#allocation15_spill] sm:$0xff] %v1521_v36  ;;  %v1537_v43 = vsub.f32 %v24_v42, %v1518_v53  ;;  %v1539_v27 = vand.u32 4294901760, %v22_v32  ;;  %985 = vmatprep.subr.mxu1 %v353_v33  ;;  %v1544_v35 = vsub.f32 %v39_v54, %v1523_v55  ;;  %956 = vmatprep.subr.mxu0 %v1516_v40 }
  0x25   :  { %1858 = vst [vmem:[#allocation16_spill] sm:$0xff] %v1531_v28  ;;  %1859 = vst [vmem:[#allocation17_spill] sm:$0xff] %v1534_v46  ;;  %v1547_v41 = vsub.f32 %v23_v59, %v1525_v56  ;;  %v1550_v23 = vsub.f32 %v38_v58, %v1527_v45  ;;  %986 = vmatpush3.msra.mxu1 %v241_v48  ;;  %v1834_v39 = vand.u32 4294901760, %v1534_v46  ;;  %957 = vmatpush3.msra.mxu0 %v1518_v53 }
  0x26   :  { %1860 = vst [vmem:[#allocation18_spill] sm:$0xff] %v1537_v43  ;;  %v1557_v49 = vsub.f32 %v22_v32, %v1539_v27  ;;  %987 = vmatprep.subr.mxu1 %v360_v47  ;;  %v1862_v59 = vand.u32 4294901760, %v1521_v36  ;;  %958 = vmatprep.subr.mxu0 %v1523_v55  ;;  %v1863_v33 = vand.u32 4294901760, %v1531_v28  ;;  %v1864_v53 = vand.u32 4294901760, %v1537_v43 }
  0x27   :  { %1861 = vst [vmem:[#allocation19_spill] sm:$0xff] %v1547_v41  ;;  %988 = vmatpush3.msra.mxu1 %v248_v29  ;;  %v373_v47 = vsub.f32 %v1534_v46, %v1834_v39  ;;  %959 = vmatpush3.msra.mxu0 %v1525_v56  ;;  %v1865_v48 = vand.u32 4294901760, %v1544_v35 }
  0x28   :  { %v366_v58 = vsub.f32 %v1521_v36, %v1862_v59  ;;  %v254_v32 = vsub.f32 %v1531_v28, %v1863_v33  ;;  %v261_v59 = vsub.f32 %v1537_v43, %v1864_v53  ;;  %v1866_v36 = vand.u32 4294901760, %v1547_v41  ;;  %960 = vmatprep.subr.mxu0 %v1527_v45 }
  0x29   :  { %v380_v29 = vsub.f32 %v1544_v35, %v1865_v48  ;;  %v1867_v28 = vand.u32 4294901760, %v1550_v23  ;;  %v374_v43 = vand.u32 4294901760, %v373_v47  ;;  %v1868_v46 = vand.u32 4294901760, %v1557_v49  ;;  %961 = vmatpush3.msra.mxu0 %v1539_v27 }
  0x2a   :  { %v367_v42 = vand.u32 4294901760, %v366_v58  ;;  %v268_v33 = vsub.f32 %v1547_v41, %v1866_v36  ;;  %v255_v53 = vand.u32 4294901760, %v254_v32  ;;  %v262_v54 = vand.u32 4294901760, %v261_v59  ;;  %1000 = vmatprep.subr.mxu0 %v1206_v14 }
  0x2b   :  { %v387_v39 = vsub.f32 %v1550_v23, %v1867_v28  ;;  %v275_v58 = vsub.f32 %v1557_v49, %v1868_v46  ;;  %v381_v48 = vand.u32 4294901760, %v380_v29 }
  0x2c   :  { %989 = vmatprep.subr.mxu1 %v367_v42  ;;  %v269_v36 = vand.u32 4294901760, %v268_v33 }
  0x2d   :  { %990 = vmatpush3.msra.mxu1 %v255_v53  ;;  %v388_v41 = vand.u32 4294901760, %v387_v39  ;;  %v276_v28 = vand.u32 4294901760, %v275_v58 }
  0x2e   :  { %991 = vmatprep.subr.mxu1 %v374_v43 }
  0x2f   :  { %992 = vmatpush3.msra.mxu1 %v262_v54 }
  0x30   :  { %993 = vmatprep.subr.mxu1 %v381_v48 }
  0x31   :  { %994 = vmatpush3.msra.mxu1 %v269_v36 }
  0x32   :  { %995 = vmatprep.subr.mxu1 %v388_v41 }
  0x33   :  { %996 = vmatpush3.msra.mxu1 %v276_v28  ;;  %v1870_v28 = vld [vmem:[#allocation2_spill] sm:$0xff] }
  0x34   :  { %1035 = vmatprep.subr.mxu1 %v1179_v4 }
  0x8d   :  { %v15_v32 = vpop.xlane.xlu0 %14 }
  0x8e   :  { %v16_v46 = vsub.f32 %v1167_v0, %v15_v32  ;;  %v17_v42 = vsub.f32 %v1172_v1, %v15_v32  ;;  %v1871_v32 = vld [vmem:[#allocation5_spill] sm:$0xff] }
  0x90   :  { %v18_v47 = vmul.f32 1.442695, %v16_v46  ;;  %v20_v59 = vmul.f32 1.442695, %v17_v42  ;;  %v1872_v46 = vld [vmem:[#allocation3_spill] sm:$0xff]  ;;  %v1873_v42 = vld [vmem:[#allocation9_spill] sm:$0xff] }
  0x92   :  { %1142 = vpow2.f32 %v18_v47  ;;  %v1874_v47 = vld [vmem:[#allocation4_spill] sm:$0xff] }
  0x93   :  { %1144 = vpow2.f32 %v20_v59  ;;  %v1875_v59 = vld [vmem:[#allocation6_spill] sm:$0xff] }
  0x9f   :  { %v1143_v29 = vpop.eup %1142 }
  0xa0   :  { %v1145_v43 = vpop.eup %1144  ;;  %v1596_v39 = vand.u32 4294901760, %v1143_v29 }
  0xa1   :  { %v1598_v54 = vand.u32 4294901760, %v1145_v43 }
  0xa2   :  { %1869 = vst [vmem:[#allocation20_spill] sm:$0xff] %v1596_v39  ;;  %v1601_v41 = vsub.f32 %v1143_v29, %v1596_v39  ;;  %v1876_v29 = vld [vmem:[#allocation7_spill] sm:$0xff] }
  0xa3   :  { %391 = vmatprep.mubr.f32.mxu1 %v1598_v54  ;;  %v151_v33 = vsub.f32 %v1145_v43, %v1598_v54  ;;  %v1877_v43 = vld [vmem:[#allocation8_spill] sm:$0xff] }
  0xa4   :  { %393 = vmatmul.mubr.f32.vlgmr.msra.gmra.mxu1 %v1596_v39  ;;  %v158_v0 = vand.u32 4294901760, %v1601_v41  ;;  %v1884_v39 = vld [vmem:[#allocation16_spill] sm:$0xff] }
  0xa5   :  { %1036 = vmatpush3.msra.mxu1 %v1190_v8  ;;  %v152_v1 = vand.u32 4294901760, %v151_v33 }
  0xa6   :  { %1037 = vmatprep.subr.mxu1 %v1192_v9  ;;  %v159_v53 = vsub.f32 %v1601_v41, %v158_v0 }
  0xa7   :  { %1038 = vmatpush3.msra.mxu1 %v1194_v10  ;;  %635 = vmatprep.mubr.f32.mxu1 %v152_v1  ;;  %v153_v58 = vsub.f32 %v151_v33, %v152_v1  ;;  %v1879_v1 = vld [vmem:[#allocation10_spill] sm:$0xff] }
  0xa8   :  { %1039 = vmatprep.subr.mxu1 %v1208_v15  ;;  %v160_v48 = vand.u32 4294901760, %v159_v53  ;;  %v1880_v53 = vld [vmem:[#allocation11_spill] sm:$0xff] }
  0xa9   :  { %1040 = vmatpush3.msra.mxu1 %v1210_v16  ;;  %v154_v36 = vand.u32 4294901760, %v153_v58  ;;  %v1881_v58 = vld [vmem:[#allocation12_spill] sm:$0xff] }
  0xaa   :  { %1041 = vmatprep.subr.mxu1 %v1212_v17 }
  0xab   :  { %1042 = vmatpush3.msra.mxu1 %v1227_v22  ;;  %155 = vmatprep.mubr.f32.mxu0 %v154_v36  ;;  %v1883_v36 = vld [vmem:[#allocation15_spill] sm:$0xff] }
  0xac   :  { %1043 = vmatprep.subr.mxu1 %v1301_v57  ;;  %161 = vmatmul.mubr.f32.vlgmr.msra.gmra.mxu0 %v160_v48  ;;  %v1882_v48 = vld [vmem:[#allocation13_spill] sm:$0xff] }
  0xad   :  { %1001 = vmatpush3.msra.mxu0 %v1219_v19  ;;  %1044 = vmatpush3.msra.mxu1 %v1306_v60 }
  0xae   :  { %1002 = vmatprep.subr.mxu0 %v1222_v20  ;;  %528 = vmatprep.mubr.f32.mxu0 %v151_v33  ;;  %v1878_v33 = vld [vmem:[#allocation14_spill] sm:$0xff] }
  0xaf   :  { %1045 = vmatprep.subr.mxu1 %v1308_v61  ;;  %1003 = vmatpush3.msra.mxu0 %v1225_v21 }
  0xb0   :  { %1046 = vmatpush3.msra.mxu1 %v1310_v62  ;;  %1004 = vmatprep.subr.mxu0 %v1232_v24 }
  0xb1   :  { %1047 = vmatprep.subr.mxu1 %v1315_v2  ;;  %1005 = vmatpush3.msra.mxu0 %v1235_v25 }
  0xb2   :  { %1048 = vmatpush3.msra.mxu1 %v1317_v3  ;;  %1006 = vmatprep.subr.mxu0 %v1238_v26 }
  0xb3   :  { %1049 = vmatprep.subr.mxu1 %v1319_v5  ;;  %1007 = vmatpush3.msra.mxu0 %v1245_v30 }
  0xb4   :  { %1050 = vmatpush3.msra.mxu1 %v1331_v12  ;;  %1008 = vmatprep.subr.mxu0 %v1313_v63 }
  0xb5   :  { %1051 = vmatprep.subr.mxu1 %v1405_v37  ;;  %1009 = vmatpush3.msra.mxu0 %v1323_v6 }
  0xb6   :  { %1052 = vmatpush3.msra.mxu1 %v1410_v13  ;;  %1010 = vmatprep.subr.mxu0 %v1326_v7 }
  0xb7   :  { %1053 = vmatprep.subr.mxu1 %v1412_v38  ;;  %1011 = vmatpush3.msra.mxu0 %v1329_v11 }
  0xb8   :  { %1054 = vmatpush3.msra.mxu1 %v1414_v34  ;;  %1012 = vmatprep.subr.mxu0 %v1336_v18 }
  0xb9   :  { %1055 = vmatprep.subr.mxu1 %v1419_v51  ;;  %1013 = vmatpush3.msra.mxu0 %v1339_v31 }
  0xba   :  { %1056 = vmatpush3.msra.mxu1 %v1421_v52  ;;  %1014 = vmatprep.subr.mxu0 %v1870_v28 }
  0xbb   :  { %1057 = vmatprep.subr.mxu1 %v1871_v32  ;;  %1015 = vmatpush3.msra.mxu0 %v1872_v46 }
  0xbc   :  { %1058 = vmatpush3.msra.mxu1 %v1873_v42  ;;  %1016 = vmatprep.subr.mxu0 %v1874_v47 }
  0xbd   :  { %1059 = vmatprep.subr.mxu1 %v1509_v44  ;;  %1017 = vmatpush3.msra.mxu0 %v1875_v59 }
  0xbe   :  { %1060 = vmatpush3.msra.mxu1 %v1514_v50  ;;  %1018 = vmatprep.subr.mxu0 %v1876_v29 }
  0xbf   :  { %1061 = vmatprep.subr.mxu1 %v1516_v40  ;;  %1019 = vmatpush3.msra.mxu0 %v1877_v43 }
  0xc0   :  { %1062 = vmatpush3.msra.mxu1 %v1878_v33  ;;  %1020 = vmatprep.subr.mxu0 %v1879_v1 }
  0xc1   :  { %1063 = vmatprep.subr.mxu1 %v1523_v55  ;;  %1021 = vmatpush3.msra.mxu0 %v1880_v53 }
  0xc2   :  { %1064 = vmatpush3.msra.mxu1 %v1525_v56  ;;  %1022 = vmatprep.subr.mxu0 %v1881_v58  ;;  %v1885_v58 = vld [vmem:[#allocation17_spill] sm:$0xff] }
  0xc3   :  { %1065 = vmatprep.subr.mxu1 %v1527_v45  ;;  %1023 = vmatpush3.msra.mxu0 %v1882_v48  ;;  %v1886_v48 = vld [vmem:[#allocation18_spill] sm:$0xff] }
  0xc4   :  { %1066 = vmatpush3.msra.mxu1 %v1539_v27  ;;  %1024 = vmatprep.subr.mxu0 %v1883_v36 }
  0xc5   :  { %639 = vmatmul.mubr.f32.vlgmr.msra.gmra.mxu1 %v158_v0  ;;  %1105 = vmatprep.subr.mxu1 %v1179_v4  ;;  %v1887_v0 = vld [vmem:[#allocation19_spill] sm:$0xff]  ;;  %v1888_v4 = vand.u32 4294901760, %v1206_v14  ;;  %v1892_v14 = vand.u32 4294901760, %v1232_v24  ;;  %v1900_v24 = vand.u32 4294901760, %v1336_v18  ;;  %v1919_v18 = vand.u32 4294901760, %v1544_v35 }
  0xc6   :  { %1025 = vmatpush3.msra.mxu0 %v1884_v39  ;;  %1106 = vmatpush3.msra.mxu1 %v1190_v8  ;;  %v1889_v8 = vand.u32 4294901760, %v1219_v19  ;;  %v1896_v19 = vand.u32 4294901760, %v1313_v63  ;;  %v1910_v63 = vld [vmem:[#allocation12_spill] sm:$0xff] }
  0xc7   :  { %909 = vmatprep.mubr.f32.mxu1 %v1598_v54  ;;  %1026 = vmatprep.subr.mxu0 %v1885_v58 }
  0xc8   :  { %1107 = vmatprep.subr.mxu1 %v1192_v9  ;;  %1027 = vmatpush3.msra.mxu0 %v1886_v48  ;;  %v1890_v9 = vand.u32 4294901760, %v1222_v20  ;;  %v1897_v20 = vand.u32 4294901760, %v1323_v6  ;;  %v1914_v6 = vand.u32 4294901760, %v1883_v36 }
  0xc9   :  { %1108 = vmatpush3.msra.mxu1 %v1194_v10  ;;  %1028 = vmatprep.subr.mxu0 %v1544_v35  ;;  %v1891_v10 = vand.u32 4294901760, %v1225_v21  ;;  %v1898_v21 = vand.u32 4294901760, %v1326_v7  ;;  %v1915_v7 = vld [vmem:[#allocation20_spill] sm:$0xff] }
  0xca   :  { %1109 = vmatprep.subr.mxu1 %v1208_v15  ;;  %1029 = vmatpush3.msra.mxu0 %v1887_v0  ;;  %v1893_v15 = vand.u32 4294901760, %v1235_v25  ;;  %v1901_v25 = vand.u32 4294901760, %v1339_v31  ;;  %v1920_v31 = vand.u32 4294901760, %v1887_v0 }
  0xcb   :  { %1110 = vmatpush3.msra.mxu1 %v1210_v16  ;;  %1030 = vmatprep.subr.mxu0 %v1550_v23  ;;  %v1894_v16 = vand.u32 4294901760, %v1238_v26  ;;  %v1902_v26 = vand.u32 4294901760, %v1870_v28 }
  0xcc   :  { %1111 = vmatprep.subr.mxu1 %v1212_v17  ;;  %1031 = vmatpush3.msra.mxu0 %v1557_v49  ;;  %v1895_v17 = vand.u32 4294901760, %v1245_v30  ;;  %v1903_v30 = vand.u32 4294901760, %v1872_v46 }
  0xcd   :  { %1112 = vmatpush3.msra.mxu1 %v1227_v22  ;;  %531 = vmatmul.mubr.f32.vlgmr.msra.gmra.mxu0 %v1601_v41  ;;  %v1899_v22 = vand.u32 4294901760, %v1329_v11  ;;  %v1916_v11 = vand.u32 4294901760, %v1884_v39 }
  0xce   :  { %1070 = vmatprep.subr.mxu0 %v1888_v4  ;;  %1113 = vmatprep.subr.mxu1 %v1301_v57  ;;  %v1906_v57 = vand.u32 4294901760, %v1876_v29 }
  0xcf   :  { %1071 = vmatpush3.msra.mxu0 %v1889_v8  ;;  %805 = vmatprep.mubr.f32.mxu0 %v1598_v54 }
  0xd0   :  { %1114 = vmatpush3.msra.mxu1 %v1306_v60  ;;  %1072 = vmatprep.subr.mxu0 %v1890_v9  ;;  %v1907_v60 = vand.u32 4294901760, %v1877_v43 }
  0xd1   :  { %1115 = vmatprep.subr.mxu1 %v1308_v61  ;;  %1073 = vmatpush3.msra.mxu0 %v1891_v10  ;;  %v1908_v61 = vand.u32 4294901760, %v1879_v1 }
  0xd2   :  { %1116 = vmatpush3.msra.mxu1 %v1310_v62  ;;  %1074 = vmatprep.subr.mxu0 %v1892_v14  ;;  %v1909_v62 = vand.u32 4294901760, %v1880_v53 }
  0xd3   :  { %1117 = vmatprep.subr.mxu1 %v1315_v2  ;;  %1075 = vmatpush3.msra.mxu0 %v1893_v15  ;;  %v1911_v2 = vand.u32 4294901760, %v1910_v63 }
  0xd4   :  { %1118 = vmatpush3.msra.mxu1 %v1317_v3  ;;  %1076 = vmatprep.subr.mxu0 %v1894_v16  ;;  %v1912_v3 = vld [vmem:[#allocation13_spill] sm:$0xff] }
  0xd5   :  { %1119 = vmatprep.subr.mxu1 %v1319_v5  ;;  %1077 = vmatpush3.msra.mxu0 %v1895_v17  ;;  %v1913_v5 = vand.u32 4294901760, %v1912_v3 }
  0xd6   :  { %1120 = vmatpush3.msra.mxu1 %v1331_v12  ;;  %1078 = vmatprep.subr.mxu0 %v1896_v19  ;;  %v1917_v12 = vand.u32 4294901760, %v1885_v58 }
  0xd7   :  { %1121 = vmatprep.subr.mxu1 %v1405_v37  ;;  %1079 = vmatpush3.msra.mxu0 %v1897_v20  ;;  %v1921_v37 = vand.u32 4294901760, %v1550_v23 }
  0xd8   :  { %1122 = vmatpush3.msra.mxu1 %v1410_v13  ;;  %1080 = vmatprep.subr.mxu0 %v1898_v21  ;;  %v1918_v13 = vand.u32 4294901760, %v1886_v48 }
  0xd9   :  { %1123 = vmatprep.subr.mxu1 %v1412_v38  ;;  %1081 = vmatpush3.msra.mxu0 %v1899_v22  ;;  %v1905_v38 = vand.u32 4294901760, %v1875_v59 }
  0xda   :  { %1124 = vmatpush3.msra.mxu1 %v1414_v34  ;;  %1082 = vmatprep.subr.mxu0 %v1900_v24  ;;  %v1904_v34 = vand.u32 4294901760, %v1874_v47 }
  0xdb   :  { %1125 = vmatprep.subr.mxu1 %v1419_v51  ;;  %1083 = vmatpush3.msra.mxu0 %v1901_v25 }
  0xdc   :  { %1126 = vmatpush3.msra.mxu1 %v1421_v52  ;;  %1084 = vmatprep.subr.mxu0 %v1902_v26 }
  0xdd   :  { %1127 = vmatprep.subr.mxu1 %v1871_v32  ;;  %1085 = vmatpush3.msra.mxu0 %v1903_v30 }
  0xde   :  { %1128 = vmatpush3.msra.mxu1 %v1873_v42  ;;  %1086 = vmatprep.subr.mxu0 %v1904_v34 }
  0xdf   :  { %1129 = vmatprep.subr.mxu1 %v1509_v44  ;;  %1087 = vmatpush3.msra.mxu0 %v1905_v38 }
  0xe0   :  { %1130 = vmatpush3.msra.mxu1 %v1514_v50  ;;  %1088 = vmatprep.subr.mxu0 %v1906_v57  ;;  %v1148_v50 = vmov 2  }
  0xe1   :  { %1131 = vmatprep.subr.mxu1 %v1516_v40  ;;  %1089 = vmatpush3.msra.mxu0 %v1907_v60  ;;  %v1922_v40 = vand.u32 4294901760, %v1557_v49 }
  0xe2   :  { %1132 = vmatpush3.msra.mxu1 %v1878_v33  ;;  %1090 = vmatprep.subr.mxu0 %v1908_v61 }
  0xe3   :  { %1133 = vmatprep.subr.mxu1 %v1523_v55  ;;  %1091 = vmatpush3.msra.mxu0 %v1909_v62 }
  0xe4   :  { %1134 = vmatpush3.msra.mxu1 %v1525_v56  ;;  %1092 = vmatprep.subr.mxu0 %v1911_v2 }
  0xe5   :  { %1135 = vmatprep.subr.mxu1 %v1527_v45  ;;  %1093 = vmatpush3.msra.mxu0 %v1913_v5 }
  0xe6   :  { %1136 = vmatpush3.msra.mxu1 %v1539_v27  ;;  %1094 = vmatprep.subr.mxu0 %v1914_v6 }
  0xe7   :  { %911 = vmatmul.mubr.f32.vlgmr.msra.gmra.mxu1 %v1915_v7  ;;  %1095 = vmatpush3.msra.mxu0 %v1916_v11 }
  0xe8   :  { %1096 = vmatprep.subr.mxu0 %v1917_v12  ;;  %1141 = vset.pattern.permute.xlu0 %v1148_v50 }
  0xe9   :  { %1097 = vmatpush3.msra.mxu0 %v1918_v13 }
  0xea   :  { %1098 = vmatprep.subr.mxu0 %v1919_v18 }
  0xeb   :  { %1099 = vmatpush3.msra.mxu0 %v1920_v31 }
  0xec   :  { %1100 = vmatprep.subr.mxu0 %v1921_v37 }
  0xed   :  { %1101 = vmatpush3.msra.mxu0 %v1922_v40 }
  0xee   :  { %807 = vmatmul.mubr.f32.vlgmr.msra.gmra.mxu0 %v1915_v7 }
 0x164   :  { %v997_v52 = vpop.f32.mrf.mxu1 }
 0x166   :  { %v998_v56 = vpop.f32.mrf.mxu1 }
 0x167   :  { %v999_v39 = vadd.f32 %v998_v56, %v997_v52 }
 0x16c   :  { %v962_v51 = vpop.f32.mrf.mxu0 }
 0x16e   :  { %v963_v44 = vpop.f32.mrf.mxu0 }
 0x16f   :  { %v964_v27 = vadd.f32 %v963_v44, %v962_v51 }
 0x171   :  { %v395_v23 = vadd.f32 %v999_v39, %v964_v27 }
 0x185   :  { %v1067_v35 = vpop.f32.mrf.mxu1 }
 0x187   :  { %v1068_v41 = vpop.f32.mrf.mxu1 }
 0x188   :  { %v1069_v46 = vadd.f32 %v1068_v41, %v1067_v35 }
 0x18d   :  { %v1032_v55 = vpop.f32.mrf.mxu0 }
 0x18f   :  { %v1033_v45 = vpop.f32.mrf.mxu0 }
 0x190   :  { %v1034_v54 = vadd.f32 %v1033_v45, %v1032_v55 }
 0x192   :  { %v533_v32 = vadd.f32 %v1034_v54, %v395_v23 }
 0x194   :  { %v641_v59 = vadd.f32 %v1069_v46, %v533_v32 }
 0x1a7   :  { %v1137_v28 = vpop.f32.mrf.mxu1 }
 0x1a9   :  { %v1138_v42 = vpop.f32.mrf.mxu1 }
 0x1aa   :  { %v1139_v43 = vadd.f32 %v1138_v42, %v1137_v28 }
 0x1ae   :  { %v1102_v49 = vpop.f32.mrf.mxu0 }
 0x1b0   :  { %v1103_v47 = vpop.f32.mrf.mxu0 }
 0x1b1   :  { %v1104_v29 = vadd.f32 %v1103_v47, %v1102_v49 }
 0x1b3   :  { %v809_v33 = vadd.f32 %v1104_v29, %v641_v59 }
 0x1b5   :  { %v913_v1 = vadd.f32 %v1139_v43, %v809_v33 }
 0x1b7   :  { %1146 = vrcp.f32 %v913_v1 }
 0x1c4   :  { %v1147_v53 = vpop.eup %1146 }
 0x1c5   :  { %920 = vperm.xlu0 %1141, %v1147_v53  }
 0x240   :  { %v921_v58 = vpop.permute.xlu0 %920 }
 0x241   :  { %v923_v48 = vmul.f32 %v921_v58, %v913_v1 }
 0x243   :  { %925 = vst.msk [vmem:[%s1780_s2] sm:$0xff] %vm924_vm0, %v923_v48 }

</bundles_post_ra>
